<compile_context>
chip_gen: v6e
topology: v6e:2x2x1
jax: 0.10.0
libtpu: 0.0.40
codegen_flags: <defaults>
</compile_context>

<pallas_src>
from functools import partial

import jax
import jax.numpy as jnp
from jax.experimental import pallas as pl
from jax.experimental.pallas import tpu as pltpu

EPS = 1e-5
FP = 128      # padded feature width (lane-dense)
OUTP = 128    # padded classifier width


# ----------------------------------------------------------------------------- kernel

def fused_gcn1_kernel(adj_ref, x_ref, wcat_ref, vec_ref, lin_w_ref, lin_b_ref, o_ref):
    # Per grid step (one graph):
    #   adj_ref: (N, N) f32   x_ref: (N, FP) f32
    # Resident across the whole grid:
    #   wcat_ref: (L, 2*FP, FP) bf16  -- rows [0:FP)=w_rel, [FP:2FP)=w_root
    #   vec_ref:  (L, 8, FP)   f32    -- rows brel, gamma, beta, alpha, pad...
    #   lin_w_ref: (FP, OUTP) bf16    lin_b_ref: (8, OUTP) f32 (bias in row 0)
    a = adj_ref[...]                      # (N, N)
    x0 = x_ref[...]                       # (N, FP)  zero-padded input features
    h = x0

    def graphconv_norm(h, i):
        v = vec_ref[i]                    # (8, FP)
        brel, gamma, beta, alpha = v[0:1], v[1:2], v[2:3], v[3:4]
        # GraphConv (sum aggregation), fused K=256 weight contraction.
        agg = jnp.dot(a, h, preferred_element_type=jnp.float32)          # (N, FP)
        cat = jnp.concatenate([agg, h], axis=-1).astype(jnp.bfloat16)    # (N, 2FP)
        y = jnp.dot(cat, wcat_ref[i], preferred_element_type=jnp.float32) + brel
        # GraphNorm over nodes (per-feature stats; N is NOT padded -> unbiased).
        mu = jnp.mean(y, axis=0, keepdims=True)
        cen = y - alpha * mu
        var = jnp.mean(cen * cen, axis=0, keepdims=True)
        return gamma * cen * jax.lax.rsqrt(var + EPS) + beta

    # convs1[0:3] / bns1[0:3] -> leaky_relu(0.1), unrolled in-kernel.
    for i in range(3):
        y = graphconv_norm(h, i)
        h = jnp.where(y > 0, y, 0.1 * y)

    # convs1[-1] / bns1[-1]: feat + norm(conv(feat1)); relu.
    y = graphconv_norm(h, 3)
    h = jnp.maximum(x0 + y, 0.0)

    # global_mean_pool (all-zero batch vector == mean over nodes) + Linear + ReLU.
    pooled = jnp.mean(h, axis=0, keepdims=True)                          # (1, FP)
    out = (jnp.dot(pooled.astype(jnp.bfloat16), lin_w_ref[...],
                   preferred_element_type=jnp.float32)
           + lin_b_ref[0:1, :])
    out = jnp.maximum(out, 0.0)                                          # (1, OUTP)
    o_ref[...] = jnp.broadcast_to(out, o_ref.shape)                      # lane-dense store


# ----------------------------------------------------------------------------- params

def init_raw_params(key, hidden_feats, out_feats):
    dims = list(hidden_feats)
    in_outs = [(dims[i], dims[i + 1]) for i in range(len(dims) - 1)] + [(dims[-1], dims[0])]
    convs, norms = [], []
    for fin, fout in in_outs:
        key, k1, k2 = jax.random.split(key, 3)
        convs.append(dict(
            wrel=jax.random.normal(k1, (fin, fout), jnp.float32) * 0.1,
            brel=jnp.zeros((1, fout), jnp.float32),
            wroot=jax.random.normal(k2, (fin, fout), jnp.float32) * 0.1,
        ))
        norms.append(dict(                                   # GraphNorm defaults
            gamma=jnp.ones((1, fout), jnp.float32),
            beta=jnp.zeros((1, fout), jnp.float32),
            alpha=jnp.ones((1, fout), jnp.float32),          # mean_scale
        ))
    key, kl = jax.random.split(key)
    lin_w = jax.random.normal(kl, (dims[0], out_feats), jnp.float32) * 0.1
    lin_b = jnp.zeros((1, out_feats), jnp.float32)
    return dict(convs=convs, norms=norms, lin_w=lin_w, lin_b=lin_b)


def pack_params(raw, hidden_feats, out_feats):
    """Zero-pad, stack and (for matmul weights) bf16-cast per-layer params."""
    num_layers = len(raw["convs"])
    wcat = jnp.zeros((num_layers, 2 * FP, FP), jnp.float32)   # [w_rel ; w_root] stacked on K
    vec = jnp.zeros((num_layers, 8, FP), jnp.float32)         # rows: brel,gamma,beta,alpha,pad
    for i, (c, g) in enumerate(zip(raw["convs"], raw["norms"])):
        fin, fout = c["wrel"].shape
        wcat = wcat.at[i, :fin, :fout].set(c["wrel"])
        wcat = wcat.at[i, FP:FP + fin, :fout].set(c["wroot"])
        vec = vec.at[i, 0, :fout].set(c["brel"][0])
        vec = vec.at[i, 1, :fout].set(g["gamma"][0])
        vec = vec.at[i, 2, :fout].set(g["beta"][0])
        vec = vec.at[i, 3, :fout].set(g["alpha"][0])
    lin_w = (jnp.zeros((FP, OUTP), jnp.float32)
             .at[:hidden_feats[0], :out_feats].set(raw["lin_w"]))
    lin_b = jnp.zeros((8, OUTP), jnp.float32).at[0, :out_feats].set(raw["lin_b"][0])
    return dict(wcat=wcat.astype(jnp.bfloat16), vec=vec,
                lin_w=lin_w.astype(jnp.bfloat16), lin_b=lin_b)


# ----------------------------------------------------------------------------- glue

def build_adjacency(edge_index, num_nodes):
    # Built ONCE per graph, outside the per-forward path.
    # PyG flow='source_to_target': A[dst, src] counts edges src->dst, so A @ X
    # sums *source* features into each target node.
    # TODO(synk): scatter-add here is plain XLA (serial over edges), no Pallas equivalent.
    return (jnp.zeros((num_nodes, num_nodes), jnp.float32)
            .at[edge_index[1], edge_index[0]].add(1.0))


@partial(jax.jit, static_argnames=("out_feats",))
def gcn1_forward(packed, adj, feat, *, out_feats):
    # adj:  (G, N, N)   feat: (G, N, F0)  -- G independent graphs per call.
    g, n, f0 = feat.shape
    num_layers = packed["wcat"].shape[0]
    x_pad = jnp.zeros((g, n, FP), jnp.float32).at[:, :, :f0].set(feat)
    const3 = lambda i: (0, 0, 0)
    const2 = lambda i: (0, 0)
    out_pad = pl.pallas_call(
        fused_gcn1_kernel,
        grid=(g,),
        out_shape=jax.ShapeDtypeStruct((g, 8, OUTP), jnp.float32),
        in_specs=[
            pl.BlockSpec((None, n, n), lambda i: (i, 0, 0)),       # per-graph adjacency
            pl.BlockSpec((None, n, FP), lambda i: (i, 0, 0)),      # per-graph features
            pl.BlockSpec((num_layers, 2 * FP, FP), const3),        # weights: resident
            pl.BlockSpec((num_layers, 8, FP), const3),             # vec slab: resident
            pl.BlockSpec((FP, OUTP), const2),                      # linear W: resident
            pl.BlockSpec((8, OUTP), const2),                       # linear b: resident
        ],
        out_specs=pl.BlockSpec((None, 8, OUTP), lambda i: (i, 0, 0)),
        compiler_params=pltpu.CompilerParams(
            dimension_semantics=("parallel",)),
    )(adj, x_pad, packed["wcat"], packed["vec"], packed["lin_w"], packed["lin_b"])
    return out_pad[:, 0, :out_feats]                          # torch.squeeze + slice off pad


# --------------------------------------------------------------------------- references

def _graphnorm(y, g):
    mu = y.mean(0, keepdims=True)
    cen = y - g["alpha"] * mu
    var = (cen * cen).mean(0, keepdims=True)
    return g["gamma"] * cen / jnp.sqrt(var + EPS) + g["beta"]


def gcn1_reference_f32(raw, adj, feat):
    """Pure-f32, unpadded reference of the PyTorch forward (semantic check)."""
    x = feat
    h = x
    def layer(h, i):
        c, g = raw["convs"][i], raw["norms"][i]
        y = (adj @ h) @ c["wrel"] + c["brel"] + h @ c["wroot"]
        return _graphnorm(y, g)
    for i in range(3):
        y = layer(h, i)
        h = jnp.where(y > 0, y, 0.1 * y)
    y = layer(h, 3)
    h = jnp.maximum(x + y, 0.0)
    pooled = h.mean(0)
    return jnp.maximum(pooled @ raw["lin_w"] + raw["lin_b"][0], 0.0)


def gcn1_reference_bf16(raw, adj, feat):
    """Reference matching the kernel's arithmetic (bf16 dot inputs, f32 accumulation)."""
    x = feat
    h = x
    def layer(h, i):
        c, g = raw["convs"][i], raw["norms"][i]
        agg = adj @ h
        y = (jnp.dot(agg.astype(jnp.bfloat16), c["wrel"].astype(jnp.bfloat16),
                     preferred_element_type=jnp.float32)
             + jnp.dot(h.astype(jnp.bfloat16), c["wroot"].astype(jnp.bfloat16),
                       preferred_element_type=jnp.float32)
             + c["brel"])
        return _graphnorm(y, g)
    for i in range(3):
        y = layer(h, i)
        h = jnp.where(y > 0, y, 0.1 * y)
    y = layer(h, 3)
    h = jnp.maximum(x + y, 0.0)
    pooled = h.mean(0, keepdims=True)
    out = jnp.dot(pooled.astype(jnp.bfloat16), raw["lin_w"].astype(jnp.bfloat16),
                  preferred_element_type=jnp.float32)[0] + raw["lin_b"][0]
    return jnp.maximum(out, 0.0)


# --------------------------------------------------------------------------------- main

if __name__ == "__main__":
    key = jax.random.PRNGKey(0)
    hidden_feats = [8, 16, 16, 8]
    out_feats = 4
    n_graphs, n_nodes, n_edges = 4, 16, 40

    key, kp, ke, kf = jax.random.split(key, 4)
    raw = init_raw_params(kp, hidden_feats, out_feats)
    packed = pack_params(raw, hidden_feats, out_feats)
    edge_index = jax.random.randint(ke, (n_graphs, 2, n_edges), 0, n_nodes, dtype=jnp.int32)
    feat = jax.random.normal(kf, (n_graphs, n_nodes, hidden_feats[0]), jnp.float32)

    adj = jax.vmap(lambda e: build_adjacency(e, n_nodes))(edge_index)   # once per graph

    out = gcn1_forward(packed, adj, feat, out_feats=out_feats)
    jax.block_until_ready(out)
    assert out.shape == (n_graphs, out_feats)

    for gi in range(n_graphs):
        ref16 = gcn1_reference_bf16(raw, adj[gi], feat[gi])   # same arithmetic -> tight
        ref32 = gcn1_reference_f32(raw, adj[gi], feat[gi])    # full-f32 semantics -> loose
        assert jnp.allclose(out[gi], ref16, rtol=2e-3, atol=2e-3), (gi, out[gi], ref16)
        assert jnp.allclose(out[gi], ref32, rtol=5e-2, atol=5e-2), (gi, out[gi], ref32)

    print("KERNEL_OK")
</pallas_src>

<mosaic_0001>
module attributes {stable_mosaic.version = 11 : i64} {
  func.func @fused_gcn1_kernel(%arg0: i32, %arg1: memref<1x16x16xf32, #tpu.memory_space<vmem>>, %arg2: memref<1x16x128xf32, #tpu.memory_space<vmem>>, %arg3: memref<4x256x128xbf16, #tpu.memory_space<vmem>>, %arg4: memref<4x8x128xf32, #tpu.memory_space<vmem>>, %arg5: memref<128x128xbf16, #tpu.memory_space<vmem>>, %arg6: memref<8x128xf32, #tpu.memory_space<vmem>>, %arg7: memref<1x8x128xf32, #tpu.memory_space<vmem>>) attributes {dimension_semantics = [#tpu.dimension_semantics<parallel>], iteration_bounds = array<i64: 4>, scalar_prefetch = 0 : i64, scratch_operands = 0 : i64, tpu.core_type = #tpu.core_type<tc>, window_params = [{transform_indices = @transform_0, window_bounds = array<i64: 1, 16, 16>}, {transform_indices = @transform_1, window_bounds = array<i64: 1, 16, 128>}, {pipeline_mode = #tpu.pipeline_mode<synchronous>, transform_indices = @transform_2, window_bounds = array<i64: 4, 256, 128>}, {pipeline_mode = #tpu.pipeline_mode<synchronous>, transform_indices = @transform_3, window_bounds = array<i64: 4, 8, 128>}, {pipeline_mode = #tpu.pipeline_mode<synchronous>, transform_indices = @transform_4, window_bounds = array<i64: 128, 128>}, {pipeline_mode = #tpu.pipeline_mode<synchronous>, transform_indices = @transform_5, window_bounds = array<i64: 8, 128>}, {transform_indices = @transform_6, window_bounds = array<i64: 1, 8, 128>}]} {
    %c0 = arith.constant 0 : index
    %c0_0 = arith.constant 0 : index
    %c0_1 = arith.constant 0 : index
    %0 = vector.load %arg1[%c0, %c0_0, %c0_1] : memref<1x16x16xf32, #tpu.memory_space<vmem>>, vector<1x16x16xf32>
    %1 = vector.shape_cast %0 : vector<1x16x16xf32> to vector<16x16xf32>
    %c0_2 = arith.constant 0 : index
    %c0_3 = arith.constant 0 : index
    %c0_4 = arith.constant 0 : index
    %2 = vector.load %arg2[%c0_2, %c0_3, %c0_4] : memref<1x16x128xf32, #tpu.memory_space<vmem>>, vector<1x16x128xf32>
    %3 = vector.shape_cast %2 : vector<1x16x128xf32> to vector<16x128xf32>
    %c0_5 = arith.constant 0 : index
    %c0_6 = arith.constant 0 : index
    %c0_7 = arith.constant 0 : index
    %4 = vector.load %arg4[%c0_5, %c0_6, %c0_7] : memref<4x8x128xf32, #tpu.memory_space<vmem>>, vector<1x8x128xf32>
    %5 = vector.shape_cast %4 : vector<1x8x128xf32> to vector<8x128xf32>
    %6 = vector.extract_strided_slice %5 {offsets = [0, 0], sizes = [1, 128], strides = [1, 1]} : vector<8x128xf32> to vector<1x128xf32>
    %7 = vector.extract_strided_slice %5 {offsets = [1, 0], sizes = [1, 128], strides = [1, 1]} : vector<8x128xf32> to vector<1x128xf32>
    %8 = vector.extract_strided_slice %5 {offsets = [2, 0], sizes = [1, 128], strides = [1, 1]} : vector<8x128xf32> to vector<1x128xf32>
    %9 = vector.extract_strided_slice %5 {offsets = [3, 0], sizes = [1, 128], strides = [1, 1]} : vector<8x128xf32> to vector<1x128xf32>
    %cst = arith.constant dense<0.000000e+00> : vector<16x128xf32>
    %10 = tpu.matmul %1, %3, %cst {dimension_numbers = #tpu.dot_dimension_numbers<[1], [0], [0], [1], [0, 0, 1, 1], [], []>} : vector<16x16xf32>, vector<16x128xf32>, vector<16x128xf32> -> vector<16x128xf32>
    %11 = tpu.concatenate %10, %3 in 1 : vector<16x128xf32>, vector<16x128xf32> -> vector<16x256xf32>
    %12 = arith.truncf %11 : vector<16x256xf32> to vector<16x256xbf16>
    %c0_8 = arith.constant 0 : index
    %c0_9 = arith.constant 0 : index
    %c0_10 = arith.constant 0 : index
    %13 = vector.load %arg3[%c0_8, %c0_9, %c0_10] : memref<4x256x128xbf16, #tpu.memory_space<vmem>>, vector<1x256x128xbf16>
    %14 = vector.shape_cast %13 : vector<1x256x128xbf16> to vector<256x128xbf16>
    %cst_11 = arith.constant dense<0.000000e+00> : vector<16x128xf32>
    %15 = tpu.matmul %12, %14, %cst_11 {dimension_numbers = #tpu.dot_dimension_numbers<[1], [0], [0], [1], [0, 0, 1, 1], [], []>} : vector<16x256xbf16>, vector<256x128xbf16>, vector<16x128xf32> -> vector<16x128xf32>
    %16 = vector.broadcast %6 : vector<1x128xf32> to vector<16x128xf32>
    %17 = arith.addf %15, %16 : vector<16x128xf32>
    %cst_12 = arith.constant dense<0.000000e+00> : vector<128xf32>
    %18 = vector.multi_reduction <add>, %17, %cst_12 [0] : vector<16x128xf32> to vector<128xf32>
    %19 = vector.shape_cast %18 : vector<128xf32> to vector<1x128xf32>
    %cst_13 = arith.constant 1.600000e+01 : f32
    %20 = vector.broadcast %cst_13 : f32 to vector<1x128xf32>
    %21 = arith.divf %19, %20 : vector<1x128xf32>
    %22 = arith.mulf %9, %21 : vector<1x128xf32>
    %23 = vector.broadcast %22 : vector<1x128xf32> to vector<16x128xf32>
    %24 = arith.subf %17, %23 : vector<16x128xf32>
    %25 = arith.mulf %24, %24 : vector<16x128xf32>
    %cst_14 = arith.constant dense<0.000000e+00> : vector<128xf32>
    %26 = vector.multi_reduction <add>, %25, %cst_14 [0] : vector<16x128xf32> to vector<128xf32>
    %27 = vector.shape_cast %26 : vector<128xf32> to vector<1x128xf32>
    %cst_15 = arith.constant 1.600000e+01 : f32
    %28 = vector.broadcast %cst_15 : f32 to vector<1x128xf32>
    %29 = arith.divf %27, %28 : vector<1x128xf32>
    %30 = vector.broadcast %7 : vector<1x128xf32> to vector<16x128xf32>
    %31 = arith.mulf %30, %24 : vector<16x128xf32>
    %cst_16 = arith.constant 9.99999974E-6 : f32
    %32 = vector.broadcast %cst_16 : f32 to vector<1x128xf32>
    %33 = arith.addf %29, %32 : vector<1x128xf32>
    %34 = math.rsqrt %33 : vector<1x128xf32>
    %35 = vector.broadcast %34 : vector<1x128xf32> to vector<16x128xf32>
    %36 = arith.mulf %31, %35 : vector<16x128xf32>
    %37 = vector.broadcast %8 : vector<1x128xf32> to vector<16x128xf32>
    %38 = arith.addf %36, %37 : vector<16x128xf32>
    %cst_17 = arith.constant 0.000000e+00 : f32
    %39 = vector.broadcast %cst_17 : f32 to vector<16x128xf32>
    %40 = arith.cmpf ogt, %38, %39 : vector<16x128xf32>
    %cst_18 = arith.constant 1.000000e-01 : f32
    %41 = vector.broadcast %cst_18 : f32 to vector<16x128xf32>
    %42 = arith.mulf %41, %38 : vector<16x128xf32>
    %43 = arith.select %40, %38, %42 : vector<16x128xi1>, vector<16x128xf32>
    %c1 = arith.constant 1 : index
    %c0_19 = arith.constant 0 : index
    %c0_20 = arith.constant 0 : index
    %44 = vector.load %arg4[%c1, %c0_19, %c0_20] : memref<4x8x128xf32, #tpu.memory_space<vmem>>, vector<1x8x128xf32>
    %45 = vector.shape_cast %44 : vector<1x8x128xf32> to vector<8x128xf32>
    %46 = vector.extract_strided_slice %45 {offsets = [0, 0], sizes = [1, 128], strides = [1, 1]} : vector<8x128xf32> to vector<1x128xf32>
    %47 = vector.extract_strided_slice %45 {offsets = [1, 0], sizes = [1, 128], strides = [1, 1]} : vector<8x128xf32> to vector<1x128xf32>
    %48 = vector.extract_strided_slice %45 {offsets = [2, 0], sizes = [1, 128], strides = [1, 1]} : vector<8x128xf32> to vector<1x128xf32>
    %49 = vector.extract_strided_slice %45 {offsets = [3, 0], sizes = [1, 128], strides = [1, 1]} : vector<8x128xf32> to vector<1x128xf32>
    %cst_21 = arith.constant dense<0.000000e+00> : vector<16x128xf32>
    %50 = tpu.matmul %1, %43, %cst_21 {dimension_numbers = #tpu.dot_dimension_numbers<[1], [0], [0], [1], [0, 0, 1, 1], [], []>} : vector<16x16xf32>, vector<16x128xf32>, vector<16x128xf32> -> vector<16x128xf32>
    %51 = tpu.concatenate %50, %43 in 1 : vector<16x128xf32>, vector<16x128xf32> -> vector<16x256xf32>
    %52 = arith.truncf %51 : vector<16x256xf32> to vector<16x256xbf16>
    %c1_22 = arith.constant 1 : index
    %c0_23 = arith.constant 0 : index
    %c0_24 = arith.constant 0 : index
    %53 = vector.load %arg3[%c1_22, %c0_23, %c0_24] : memref<4x256x128xbf16, #tpu.memory_space<vmem>>, vector<1x256x128xbf16>
    %54 = vector.shape_cast %53 : vector<1x256x128xbf16> to vector<256x128xbf16>
    %cst_25 = arith.constant dense<0.000000e+00> : vector<16x128xf32>
    %55 = tpu.matmul %52, %54, %cst_25 {dimension_numbers = #tpu.dot_dimension_numbers<[1], [0], [0], [1], [0, 0, 1, 1], [], []>} : vector<16x256xbf16>, vector<256x128xbf16>, vector<16x128xf32> -> vector<16x128xf32>
    %56 = vector.broadcast %46 : vector<1x128xf32> to vector<16x128xf32>
    %57 = arith.addf %55, %56 : vector<16x128xf32>
    %cst_26 = arith.constant dense<0.000000e+00> : vector<128xf32>
    %58 = vector.multi_reduction <add>, %57, %cst_26 [0] : vector<16x128xf32> to vector<128xf32>
    %59 = vector.shape_cast %58 : vector<128xf32> to vector<1x128xf32>
    %cst_27 = arith.constant 1.600000e+01 : f32
    %60 = vector.broadcast %cst_27 : f32 to vector<1x128xf32>
    %61 = arith.divf %59, %60 : vector<1x128xf32>
    %62 = arith.mulf %49, %61 : vector<1x128xf32>
    %63 = vector.broadcast %62 : vector<1x128xf32> to vector<16x128xf32>
    %64 = arith.subf %57, %63 : vector<16x128xf32>
    %65 = arith.mulf %64, %64 : vector<16x128xf32>
    %cst_28 = arith.constant dense<0.000000e+00> : vector<128xf32>
    %66 = vector.multi_reduction <add>, %65, %cst_28 [0] : vector<16x128xf32> to vector<128xf32>
    %67 = vector.shape_cast %66 : vector<128xf32> to vector<1x128xf32>
    %cst_29 = arith.constant 1.600000e+01 : f32
    %68 = vector.broadcast %cst_29 : f32 to vector<1x128xf32>
    %69 = arith.divf %67, %68 : vector<1x128xf32>
    %70 = vector.broadcast %47 : vector<1x128xf32> to vector<16x128xf32>
    %71 = arith.mulf %70, %64 : vector<16x128xf32>
    %cst_30 = arith.constant 9.99999974E-6 : f32
    %72 = vector.broadcast %cst_30 : f32 to vector<1x128xf32>
    %73 = arith.addf %69, %72 : vector<1x128xf32>
    %74 = math.rsqrt %73 : vector<1x128xf32>
    %75 = vector.broadcast %74 : vector<1x128xf32> to vector<16x128xf32>
    %76 = arith.mulf %71, %75 : vector<16x128xf32>
    %77 = vector.broadcast %48 : vector<1x128xf32> to vector<16x128xf32>
    %78 = arith.addf %76, %77 : vector<16x128xf32>
    %cst_31 = arith.constant 0.000000e+00 : f32
    %79 = vector.broadcast %cst_31 : f32 to vector<16x128xf32>
    %80 = arith.cmpf ogt, %78, %79 : vector<16x128xf32>
    %cst_32 = arith.constant 1.000000e-01 : f32
    %81 = vector.broadcast %cst_32 : f32 to vector<16x128xf32>
    %82 = arith.mulf %81, %78 : vector<16x128xf32>
    %83 = arith.select %80, %78, %82 : vector<16x128xi1>, vector<16x128xf32>
    %c2 = arith.constant 2 : index
    %c0_33 = arith.constant 0 : index
    %c0_34 = arith.constant 0 : index
    %84 = vector.load %arg4[%c2, %c0_33, %c0_34] : memref<4x8x128xf32, #tpu.memory_space<vmem>>, vector<1x8x128xf32>
    %85 = vector.shape_cast %84 : vector<1x8x128xf32> to vector<8x128xf32>
    %86 = vector.extract_strided_slice %85 {offsets = [0, 0], sizes = [1, 128], strides = [1, 1]} : vector<8x128xf32> to vector<1x128xf32>
    %87 = vector.extract_strided_slice %85 {offsets = [1, 0], sizes = [1, 128], strides = [1, 1]} : vector<8x128xf32> to vector<1x128xf32>
    %88 = vector.extract_strided_slice %85 {offsets = [2, 0], sizes = [1, 128], strides = [1, 1]} : vector<8x128xf32> to vector<1x128xf32>
    %89 = vector.extract_strided_slice %85 {offsets = [3, 0], sizes = [1, 128], strides = [1, 1]} : vector<8x128xf32> to vector<1x128xf32>
    %cst_35 = arith.constant dense<0.000000e+00> : vector<16x128xf32>
    %90 = tpu.matmul %1, %83, %cst_35 {dimension_numbers = #tpu.dot_dimension_numbers<[1], [0], [0], [1], [0, 0, 1, 1], [], []>} : vector<16x16xf32>, vector<16x128xf32>, vector<16x128xf32> -> vector<16x128xf32>
    %91 = tpu.concatenate %90, %83 in 1 : vector<16x128xf32>, vector<16x128xf32> -> vector<16x256xf32>
    %92 = arith.truncf %91 : vector<16x256xf32> to vector<16x256xbf16>
    %c2_36 = arith.constant 2 : index
    %c0_37 = arith.constant 0 : index
    %c0_38 = arith.constant 0 : index
    %93 = vector.load %arg3[%c2_36, %c0_37, %c0_38] : memref<4x256x128xbf16, #tpu.memory_space<vmem>>, vector<1x256x128xbf16>
    %94 = vector.shape_cast %93 : vector<1x256x128xbf16> to vector<256x128xbf16>
    %cst_39 = arith.constant dense<0.000000e+00> : vector<16x128xf32>
    %95 = tpu.matmul %92, %94, %cst_39 {dimension_numbers = #tpu.dot_dimension_numbers<[1], [0], [0], [1], [0, 0, 1, 1], [], []>} : vector<16x256xbf16>, vector<256x128xbf16>, vector<16x128xf32> -> vector<16x128xf32>
    %96 = vector.broadcast %86 : vector<1x128xf32> to vector<16x128xf32>
    %97 = arith.addf %95, %96 : vector<16x128xf32>
    %cst_40 = arith.constant dense<0.000000e+00> : vector<128xf32>
    %98 = vector.multi_reduction <add>, %97, %cst_40 [0] : vector<16x128xf32> to vector<128xf32>
    %99 = vector.shape_cast %98 : vector<128xf32> to vector<1x128xf32>
    %cst_41 = arith.constant 1.600000e+01 : f32
    %100 = vector.broadcast %cst_41 : f32 to vector<1x128xf32>
    %101 = arith.divf %99, %100 : vector<1x128xf32>
    %102 = arith.mulf %89, %101 : vector<1x128xf32>
    %103 = vector.broadcast %102 : vector<1x128xf32> to vector<16x128xf32>
    %104 = arith.subf %97, %103 : vector<16x128xf32>
    %105 = arith.mulf %104, %104 : vector<16x128xf32>
    %cst_42 = arith.constant dense<0.000000e+00> : vector<128xf32>
    %106 = vector.multi_reduction <add>, %105, %cst_42 [0] : vector<16x128xf32> to vector<128xf32>
    %107 = vector.shape_cast %106 : vector<128xf32> to vector<1x128xf32>
    %cst_43 = arith.constant 1.600000e+01 : f32
    %108 = vector.broadcast %cst_43 : f32 to vector<1x128xf32>
    %109 = arith.divf %107, %108 : vector<1x128xf32>
    %110 = vector.broadcast %87 : vector<1x128xf32> to vector<16x128xf32>
    %111 = arith.mulf %110, %104 : vector<16x128xf32>
    %cst_44 = arith.constant 9.99999974E-6 : f32
    %112 = vector.broadcast %cst_44 : f32 to vector<1x128xf32>
    %113 = arith.addf %109, %112 : vector<1x128xf32>
    %114 = math.rsqrt %113 : vector<1x128xf32>
    %115 = vector.broadcast %114 : vector<1x128xf32> to vector<16x128xf32>
    %116 = arith.mulf %111, %115 : vector<16x128xf32>
    %117 = vector.broadcast %88 : vector<1x128xf32> to vector<16x128xf32>
    %118 = arith.addf %116, %117 : vector<16x128xf32>
    %cst_45 = arith.constant 0.000000e+00 : f32
    %119 = vector.broadcast %cst_45 : f32 to vector<16x128xf32>
    %120 = arith.cmpf ogt, %118, %119 : vector<16x128xf32>
    %cst_46 = arith.constant 1.000000e-01 : f32
    %121 = vector.broadcast %cst_46 : f32 to vector<16x128xf32>
    %122 = arith.mulf %121, %118 : vector<16x128xf32>
    %123 = arith.select %120, %118, %122 : vector<16x128xi1>, vector<16x128xf32>
    %c3 = arith.constant 3 : index
    %c0_47 = arith.constant 0 : index
    %c0_48 = arith.constant 0 : index
    %124 = vector.load %arg4[%c3, %c0_47, %c0_48] : memref<4x8x128xf32, #tpu.memory_space<vmem>>, vector<1x8x128xf32>
    %125 = vector.shape_cast %124 : vector<1x8x128xf32> to vector<8x128xf32>
    %126 = vector.extract_strided_slice %125 {offsets = [0, 0], sizes = [1, 128], strides = [1, 1]} : vector<8x128xf32> to vector<1x128xf32>
    %127 = vector.extract_strided_slice %125 {offsets = [1, 0], sizes = [1, 128], strides = [1, 1]} : vector<8x128xf32> to vector<1x128xf32>
    %128 = vector.extract_strided_slice %125 {offsets = [2, 0], sizes = [1, 128], strides = [1, 1]} : vector<8x128xf32> to vector<1x128xf32>
    %129 = vector.extract_strided_slice %125 {offsets = [3, 0], sizes = [1, 128], strides = [1, 1]} : vector<8x128xf32> to vector<1x128xf32>
    %cst_49 = arith.constant dense<0.000000e+00> : vector<16x128xf32>
    %130 = tpu.matmul %1, %123, %cst_49 {dimension_numbers = #tpu.dot_dimension_numbers<[1], [0], [0], [1], [0, 0, 1, 1], [], []>} : vector<16x16xf32>, vector<16x128xf32>, vector<16x128xf32> -> vector<16x128xf32>
    %131 = tpu.concatenate %130, %123 in 1 : vector<16x128xf32>, vector<16x128xf32> -> vector<16x256xf32>
    %132 = arith.truncf %131 : vector<16x256xf32> to vector<16x256xbf16>
    %c3_50 = arith.constant 3 : index
    %c0_51 = arith.constant 0 : index
    %c0_52 = arith.constant 0 : index
    %133 = vector.load %arg3[%c3_50, %c0_51, %c0_52] : memref<4x256x128xbf16, #tpu.memory_space<vmem>>, vector<1x256x128xbf16>
    %134 = vector.shape_cast %133 : vector<1x256x128xbf16> to vector<256x128xbf16>
    %cst_53 = arith.constant dense<0.000000e+00> : vector<16x128xf32>
    %135 = tpu.matmul %132, %134, %cst_53 {dimension_numbers = #tpu.dot_dimension_numbers<[1], [0], [0], [1], [0, 0, 1, 1], [], []>} : vector<16x256xbf16>, vector<256x128xbf16>, vector<16x128xf32> -> vector<16x128xf32>
    %136 = vector.broadcast %126 : vector<1x128xf32> to vector<16x128xf32>
    %137 = arith.addf %135, %136 : vector<16x128xf32>
    %cst_54 = arith.constant dense<0.000000e+00> : vector<128xf32>
    %138 = vector.multi_reduction <add>, %137, %cst_54 [0] : vector<16x128xf32> to vector<128xf32>
    %139 = vector.shape_cast %138 : vector<128xf32> to vector<1x128xf32>
    %cst_55 = arith.constant 1.600000e+01 : f32
    %140 = vector.broadcast %cst_55 : f32 to vector<1x128xf32>
    %141 = arith.divf %139, %140 : vector<1x128xf32>
    %142 = arith.mulf %129, %141 : vector<1x128xf32>
    %143 = vector.broadcast %142 : vector<1x128xf32> to vector<16x128xf32>
    %144 = arith.subf %137, %143 : vector<16x128xf32>
    %145 = arith.mulf %144, %144 : vector<16x128xf32>
    %cst_56 = arith.constant dense<0.000000e+00> : vector<128xf32>
    %146 = vector.multi_reduction <add>, %145, %cst_56 [0] : vector<16x128xf32> to vector<128xf32>
    %147 = vector.shape_cast %146 : vector<128xf32> to vector<1x128xf32>
    %cst_57 = arith.constant 1.600000e+01 : f32
    %148 = vector.broadcast %cst_57 : f32 to vector<1x128xf32>
    %149 = arith.divf %147, %148 : vector<1x128xf32>
    %150 = vector.broadcast %127 : vector<1x128xf32> to vector<16x128xf32>
    %151 = arith.mulf %150, %144 : vector<16x128xf32>
    %cst_58 = arith.constant 9.99999974E-6 : f32
    %152 = vector.broadcast %cst_58 : f32 to vector<1x128xf32>
    %153 = arith.addf %149, %152 : vector<1x128xf32>
    %154 = math.rsqrt %153 : vector<1x128xf32>
    %155 = vector.broadcast %154 : vector<1x128xf32> to vector<16x128xf32>
    %156 = arith.mulf %151, %155 : vector<16x128xf32>
    %157 = vector.broadcast %128 : vector<1x128xf32> to vector<16x128xf32>
    %158 = arith.addf %156, %157 : vector<16x128xf32>
    %159 = arith.addf %3, %158 : vector<16x128xf32>
    %cst_59 = arith.constant 0.000000e+00 : f32
    %160 = vector.broadcast %cst_59 : f32 to vector<16x128xf32>
    %161 = arith.maximumf %159, %160 : vector<16x128xf32>
    %cst_60 = arith.constant dense<0.000000e+00> : vector<128xf32>
    %162 = vector.multi_reduction <add>, %161, %cst_60 [0] : vector<16x128xf32> to vector<128xf32>
    %163 = vector.shape_cast %162 : vector<128xf32> to vector<1x128xf32>
    %cst_61 = arith.constant 1.600000e+01 : f32
    %164 = vector.broadcast %cst_61 : f32 to vector<1x128xf32>
    %165 = arith.divf %163, %164 : vector<1x128xf32>
    %166 = arith.truncf %165 : vector<1x128xf32> to vector<1x128xbf16>
    %c0_62 = arith.constant 0 : index
    %c0_63 = arith.constant 0 : index
    %167 = vector.load %arg5[%c0_62, %c0_63] : memref<128x128xbf16, #tpu.memory_space<vmem>>, vector<128x128xbf16>
    %cst_64 = arith.constant dense<0.000000e+00> : vector<1x128xf32>
    %168 = tpu.matmul %166, %167, %cst_64 {dimension_numbers = #tpu.dot_dimension_numbers<[1], [0], [0], [1], [0, 0, 1, 1], [], []>} : vector<1x128xbf16>, vector<128x128xbf16>, vector<1x128xf32> -> vector<1x128xf32>
    %c0_65 = arith.constant 0 : index
    %c0_66 = arith.constant 0 : index
    %169 = vector.load %arg6[%c0_65, %c0_66] : memref<8x128xf32, #tpu.memory_space<vmem>>, vector<1x128xf32>
    %170 = arith.addf %168, %169 : vector<1x128xf32>
    %cst_67 = arith.constant 0.000000e+00 : f32
    %171 = vector.broadcast %cst_67 : f32 to vector<1x128xf32>
    %172 = arith.maximumf %170, %171 : vector<1x128xf32>
    %173 = vector.shape_cast %172 : vector<1x128xf32> to vector<1x128xf32>
    %174 = vector.broadcast %173 : vector<1x128xf32> to vector<8x128xf32>
    %c0_68 = arith.constant 0 : index
    %c0_69 = arith.constant 0 : index
    %c0_70 = arith.constant 0 : index
    %175 = vector.load %arg7[%c0_68, %c0_69, %c0_70] : memref<1x8x128xf32, #tpu.memory_space<vmem>>, vector<1x8x128xf32>
    %176 = vector.shape_cast %175 : vector<1x8x128xf32> to vector<8x128xf32>
    %177 = vector.shape_cast %174 : vector<8x128xf32> to vector<1x8x128xf32>
    tpu.vector_store %arg7[%c0_68, %c0_69, %c0_70], %177 {strides = array<i32>} : memref<1x8x128xf32, #tpu.memory_space<vmem>>, vector<1x8x128xf32>,
    return
  }
  func.func @transform_0(%arg0: i32) -> (i32, i32, i32) {
    %c0_i32 = arith.constant 0 : i32
    %c0_i32_0 = arith.constant 0 : i32
    %c0_i32_1 = arith.constant 0 : i32
    return %arg0, %c0_i32, %c0_i32_0 : i32, i32, i32
  }
  func.func @transform_1(%arg0: i32) -> (i32, i32, i32) {
    %c0_i32 = arith.constant 0 : i32
    %c0_i32_0 = arith.constant 0 : i32
    %c0_i32_1 = arith.constant 0 : i32
    return %arg0, %c0_i32, %c0_i32_0 : i32, i32, i32
  }
  func.func @transform_2(%arg0: i32) -> (i32, i32, i32) {
    %c0_i32 = arith.constant 0 : i32
    %c0_i32_0 = arith.constant 0 : i32
    %c0_i32_1 = arith.constant 0 : i32
    %c0_i32_2 = arith.constant 0 : i32
    return %c0_i32, %c0_i32_0, %c0_i32_1 : i32, i32, i32
  }
  func.func @transform_3(%arg0: i32) -> (i32, i32, i32) {
    %c0_i32 = arith.constant 0 : i32
    %c0_i32_0 = arith.constant 0 : i32
    %c0_i32_1 = arith.constant 0 : i32
    %c0_i32_2 = arith.constant 0 : i32
    return %c0_i32, %c0_i32_0, %c0_i32_1 : i32, i32, i32
  }
  func.func @transform_4(%arg0: i32) -> (i32, i32) {
    %c0_i32 = arith.constant 0 : i32
    %c0_i32_0 = arith.constant 0 : i32
    %c0_i32_1 = arith.constant 0 : i32
    return %c0_i32, %c0_i32_0 : i32, i32
  }
  func.func @transform_5(%arg0: i32) -> (i32, i32) {
    %c0_i32 = arith.constant 0 : i32
    %c0_i32_0 = arith.constant 0 : i32
    %c0_i32_1 = arith.constant 0 : i32
    return %c0_i32, %c0_i32_0 : i32, i32
  }
  func.func @transform_6(%arg0: i32) -> (i32, i32, i32) {
    %c0_i32 = arith.constant 0 : i32
    %c0_i32_0 = arith.constant 0 : i32
    %c0_i32_1 = arith.constant 0 : i32
    return %arg0, %c0_i32, %c0_i32_0 : i32, i32, i32
  }
}

</mosaic_0001>

<bundles_post_ra>
// kernel: gcn1_forward.1
= control target key start
LH: loop header
LB: loop body
LE: loop exit
PB: predicated region body
PF: predicated region fallthrough
CT: control target
= control target key end

     0   :  { %11 = vsyncpa [#allocation3], 0  ;;  %s2134_s21 = smov 0   ;;  %s2262_s0 = inlined_call_operand.vmem [shape: f32[4,16,16], index: 0, kind: input, shape index: {}]   ;;  %s2263_s1 = inlined_call_operand.vmem [shape: f32[4,16,128], index: 1, kind: input, shape index: {}]   ;;  %s2264_s2 = inlined_call_operand.hbm [shape: bf16[4,256,128], index: 2, kind: input, shape index: {}]   ;;  %s2265_s3 = inlined_call_operand.vmem [shape: f32[4,8,128], index: 3, kind: input, shape index: {}]   ;;  %s2266_s4 = inlined_call_operand.vmem [shape: bf16[128,128], index: 4, kind: input, shape index: {}]   ;;  %s2267_s5 = inlined_call_operand.vmem [shape: f32[8,128], index: 5, kind: input, shape index: {}]   ;;  %s2268_s6 = inlined_call_operand.vmem [shape: f32[4,8,128], index: 6, kind: output, shape index: {}]  }
   0x1 LB: > { %s1691_s22 = sadd.s32 4294967295, %s2092_s21   ;;  %p1693_p0 = scmp.ge.s32.totalorder %s2092_s21, 1  ;;  %s2092_s21 = sphi %s2134_s21, %s17_s21  }
   0x2   : > { %p184_p1 = scmp.lt.s32.totalorder %s2092_s21, 5  ;;  %s2094_s23 = smov [#allocation2]  }
   0x3   : > { %s196_s24 = sshll.u32 %s2094_s23, 4  ;;  %p1959_p3 = scmp.eq.s32.totalorder %s1691_s22, 0  ;;  %s197_s24 = int_to_ptr.vmem [resolvable:$true] %s196_s24 }
   0x4   : > { %p2142_p2 = pnand %p1693_p0, %p184_p1  ;;  %s2067_s26 = scalar_lea.vmem %s197_s24, 8192 }
   0x5   : > { %p2068_p7 = scmp.ne.s32.totalorder %s197_s24, %s2067_s26  ;;  %p2075_p10 = scmp.lt.s32.totalorder %s197_s24, %s197_s24 }
   0x6   : > { %p1955_p4 = pneg %p2142_p2  ;;  %p2076_p11 = scmp.lt.s32.totalorder %s2067_s26, %s2067_s26 }
   0x8   : > { %p1956_p5 = pnand %p1959_p3, %p1955_p4  ;;  %p2077_p12 = por %p2076_p11, %p2075_p10 }
   0xa   : > { %p2058_p6 = pneg %p1956_p5 }
   0xc   : > { %p2070_p8 = pnand %p2068_p7, %p2058_p6 }
   0xe   : > { %p2071_p9 = pneg %p2070_p8 }
  0x10   : > { %p2078_p13 = pnand %p2077_p12, %p2071_p9 }
  0x12   : > { %2081 = shalt.err (!%p2078_p13)
}
  0x13   : > { %s2095_s27 = smov 64   ;;  %s2096_s28 = smov 4  }
  0x14   : > { %1958 = dma.hbm_to_vmem [thread:$0]  (!%p1956_p5), %s2264_s2, 8192, %s197_s24, [#allocation3], %s2095_s27, %s2095_s27, %s2096_s28  }
  0x15   : > { %237 = sbr.rel (%p2142_p2) target bundleno = 2120 (0x848), region = 44 }
  0x1a   : > { %2087 = dma.done.wait (%p1959_p3), [#allocation3], 8192  }
  0x1b   : > { %2089 = vsyncadd (%p1959_p3), [#allocation3], 4294959104  ;;  %p271_p0 = scmp.lt.s32.totalorder %s1691_s22, 3  ;;  %vm291_vm0 = vcmask 130048   ;;  %v1974_v4 = vld [vmem:[#allocation2 + $0x78] sm:$0xff]   ;;  %v1976_v6 = vld [vmem:[#allocation2 + $0x70] sm:$0xff]   ;;  %v407_v38 = vlaneseq }
  0x1c   : > { %v1975_v5 = vld [vmem:[#allocation2 + $0x38] sm:$0xff]   ;;  %v1977_v7 = vld [vmem:[#allocation2 + $0x30] sm:$0xff]   ;;  %v1978_v8 = vld [vmem:[#allocation2 + $0x68] sm:$0xff]   ;;  %vm2098_vm7 = vmmov 0  }
  0x1d   : > { %s2271_s22 = smov (!%p271_p0, %s1691_s22), 3  ;;  %v1979_v9 = vld [vmem:[#allocation2 + $0x28] sm:$0xff]   ;;  %v1980_v10 = vld [vmem:[#allocation2 + $0x60] sm:$0xff]   ;;  %v1982_v12 = vld [vmem:[#allocation2 + $0x58] sm:$0xff]   ;;  %v408_v39 = vshrl.u32 %v407_v38, 7 }
  0x1e   : > { %s1788_s7 = sshll.u32 %s2271_s22, 4  ;;  %v1981_v11 = vld [vmem:[#allocation2 + $0x20] sm:$0xff]   ;;  %v1983_v13 = vld [vmem:[#allocation2 + $0x18] sm:$0xff]   ;;  %v1984_v14 = vld [vmem:[#allocation2 + $0x50] sm:$0xff]  }
  0x1f   : > { %s2162_s10 = scalar_lea.vmem %s2263_s1, %s1788_s7  ;;  %s275_s13 = scalar_lea.vmem %s2262_s0, %s1788_s7  ;;  %v1985_v15 = vld [vmem:[#allocation2 + $0x10] sm:$0xff]   ;;  %v1986_v16 = vld [vmem:[#allocation2 + $0x48] sm:$0xff]   ;;  %v1988_v18 = vld [vmem:[#allocation2 + $0x40] sm:$0xff]   ;;  %v2179_v41 = vsub.s32 0, %v408_v39  ;;  %v2185_v59 = vsub.s32 3, %v408_v39 }
  0x20   : > { %v289_v0 = vld [vmem:[%s2162_s10 + $0x8] sm:$0xff]  ;;  %v288_v1 = vld [vmem:[%s2162_s10] sm:$0xff]  ;;  %v1990_v24 = vld [vmem:[#allocation2 + $0xf8] sm:$0xff]  }
  0x21   : > { %v2169_v2 = vld [vmem:[%s275_s13] sm:$0xff]  ;;  %1903 = vmatprep.subr.mxu1 %v289_v0  ;;  %v2173_v3 = vld [vmem:[%s275_s13 + $0x8] sm:$0xff]  ;;  %v374_v20 = vpack.c.bf16 %v289_v0, %v288_v1  ;;  %v1991_v25 = vld [vmem:[#allocation2 + $0xb8] sm:$0xff]   ;;  %1820 = vmatprep.subr.bf16.mxu0 %v1990_v24 }
  0x22   : > { %1907 = vmatprep.mubr.msk.f32.mxu1 %vm291_vm0, %v2169_v2  ;;  %1904 = vmatpush3.msra.mxu1 %v289_v0  ;;  %v1987_v17 = vld [vmem:[#allocation2 + $0x8] sm:$0xff]   ;;  %v1989_v19 = vld [vmem:[#allocation2] sm:$0xff]   ;;  %v1992_v26 = vld [vmem:[#allocation2 + $0xf0] sm:$0xff]  }
  0x23   : > { %1905 = vmatprep.subr.mxu1 %v288_v1  ;;  %1821 = vmatpush3.bf16.msra.mxu0 %v1991_v25  ;;  %v1993_v27 = vld [vmem:[#allocation2 + $0xb0] sm:$0xff]   ;;  %v1994_v28 = vld [vmem:[#allocation2 + $0xe8] sm:$0xff]   ;;  %v1996_v30 = vld [vmem:[#allocation2 + $0xe0] sm:$0xff]  }
  0x24   : > { %1906 = vmatpush3.msra.mxu1 %v288_v1  ;;  %1822 = vmatprep.subr.bf16.mxu0 %v1992_v26  ;;  %v1995_v29 = vld [vmem:[#allocation2 + $0xa8] sm:$0xff]   ;;  %v1997_v31 = vld [vmem:[#allocation2 + $0xa0] sm:$0xff]   ;;  %v1998_v32 = vld [vmem:[#allocation2 + $0xd8] sm:$0xff]  }
  0x25   : > { %1908 = vmatmul.mubr.msk.f32.vlgmr.msra.gmra.mxu1 %vm291_vm0, %v2173_v3  ;;  %1794 = vmatprep.subr.bf16.mxu1 %v1974_v4  ;;  %v1999_v33 = vld [vmem:[#allocation2 + $0x98] sm:$0xff]   ;;  %v2000_v34 = vld [vmem:[#allocation2 + $0xd0] sm:$0xff]   ;;  %v2002_v36 = vld [vmem:[#allocation2 + $0xc8] sm:$0xff]  }
  0x26   : > { %1795 = vmatpush3.bf16.msra.mxu1 %v1975_v5  ;;  %539 = vmatprep.mubr.bf16.mxu1 %v374_v20  ;;  %v2001_v35 = vld [vmem:[#allocation2 + $0x90] sm:$0xff]   ;;  %v2003_v37 = vld [vmem:[#allocation2 + $0x88] sm:$0xff]   ;;  %v290_v42 = vld [vmem:[%s2265_s3] sm:$0xff] }
  0x27   : > { %1796 = vmatprep.subr.bf16.mxu1 %v1976_v6  ;;  %1823 = vmatpush3.bf16.msra.mxu0 %v1993_v27  ;;  %v410_v45 = vrot.slane %v290_v42, %v2179_v41  ;;  %v2010_v38 = vld [vmem:[#allocation2 + $0x168] sm:$0xff]  }
  0x28   : > { %1824 = vmatprep.subr.bf16.mxu0 %v1994_v28 }
  0x2a   : > { %1797 = vmatpush3.bf16.msra.mxu1 %v1977_v7 }
  0x2b   : > { %1798 = vmatprep.subr.bf16.mxu1 %v1978_v8  ;;  %1825 = vmatpush3.bf16.msra.mxu0 %v1995_v29  ;;  %v2004_v29 = vld [vmem:[#allocation2 + $0xc0] sm:$0xff]  }
  0x2c   : > { %1826 = vmatprep.subr.bf16.mxu0 %v1996_v30  ;;  %v2005_v30 = vld [vmem:[#allocation2 + $0x80] sm:$0xff]  }
  0x2e   : > { %1799 = vmatpush3.bf16.msra.mxu1 %v1979_v9 }
  0x2f   : > { %1800 = vmatprep.subr.bf16.mxu1 %v1980_v10  ;;  %1827 = vmatpush3.bf16.msra.mxu0 %v1997_v31 }
  0x30   : > { %1828 = vmatprep.subr.bf16.mxu0 %v1998_v32 }
  0x32   : > { %1801 = vmatpush3.bf16.msra.mxu1 %v1981_v11 }
  0x33   : > { %1802 = vmatprep.subr.bf16.mxu1 %v1982_v12  ;;  %1829 = vmatpush3.bf16.msra.mxu0 %v1999_v33 }
  0x34   : > { %1830 = vmatprep.subr.bf16.mxu0 %v2000_v34  ;;  %v2006_v34 = vld [vmem:[#allocation2 + $0x178] sm:$0xff]  }
  0x36   : > { %1803 = vmatpush3.bf16.msra.mxu1 %v1983_v13  ;;  %v2188_v13 = vsub.s32 1, %v408_v39 }
  0x37   : > { %1804 = vmatprep.subr.bf16.mxu1 %v1984_v14  ;;  %1831 = vmatpush3.bf16.msra.mxu0 %v2001_v35  ;;  %v2007_v35 = vld [vmem:[#allocation2 + $0x138] sm:$0xff]  }
  0x38   : > { %1832 = vmatprep.subr.bf16.mxu0 %v2002_v36  ;;  %v577_v14 = vrot.slane %v290_v42, %v2188_v13  ;;  %v2008_v36 = vld [vmem:[#allocation2 + $0x170] sm:$0xff]  }
  0x3a   : > { %1805 = vmatpush3.bf16.msra.mxu1 %v1985_v15  ;;  %v2191_v15 = vsub.s32 2, %v408_v39  ;;  %v2011_v39 = vld [vmem:[#allocation2 + $0x128] sm:$0xff]  }
  0x3b   : > { %1806 = vmatprep.subr.bf16.mxu1 %v1986_v16  ;;  %1833 = vmatpush3.bf16.msra.mxu0 %v2003_v37  ;;  %v2009_v37 = vld [vmem:[#allocation2 + $0x130] sm:$0xff]  }
  0x3c   : > { %1834 = vmatprep.subr.bf16.mxu0 %v2004_v29 }
  0x3e   : > { %1807 = vmatpush3.bf16.msra.mxu1 %v1987_v17  ;;  %v587_v17 = vrot.slane %v290_v42, %v2191_v15 }
  0x3f   : > { %1808 = vmatprep.subr.bf16.mxu1 %v1988_v18  ;;  %1835 = vmatpush3.bf16.msra.mxu0 %v2005_v30 }
  0x40   : > { %1846 = vmatprep.subr.bf16.mxu0 %v2006_v34 }
  0x42   : > { %1809 = vmatpush3.bf16.msra.mxu1 %v1989_v19 }
  0xe5   : > { %v1909_v21 = vpop.f32.mrf.mxu1 }
  0xe7   : > { %v364_v22 = vpop.f32.mrf.mxu1 }
  0xe8   : > { %v373_v23 = vpack.c.bf16 %v1909_v21, %v364_v22 }
  0xea   : > { %540 = vmatmul.mubr.bf16.vlgmr.msra.gmra.mxu1 %v373_v23 }
  0xeb   : > { %1914 = vmatprep.mubr.msk.f32.mxu1 %vm291_vm0, %v2169_v2 }
 0x1aa   : > { %v1810_v40 = vpop.f32.mrf.mxu1 }
 0x1ac   : > { %v1811_v43 = vpop.f32.mrf.mxu1 }
 0x1ad   : > { %v1812_v46 = vadd.f32 %v1811_v43, %v1810_v40  ;;  %v2012_v40 = vld [vmem:[#allocation2 + $0x160] sm:$0xff]   ;;  %v2014_v43 = vld [vmem:[#allocation2 + $0x158] sm:$0xff]  }
 0x1ae   : > { %v1813_v44 = vpop.f32.mrf.mxu1 }
 0x1af   : > { %v542_v49 = vadd.f32 %v1812_v46, %v410_v45  ;;  %v2017_v46 = vld [vmem:[#allocation2 + $0x110] sm:$0xff]  }
 0x1b0   : > { %v1814_v47 = vpop.f32.mrf.mxu1 }
 0x1b1   : > { %v1815_v48 = vadd.f32 %v1814_v47, %v1813_v44  ;;  %v2015_v44 = vld [vmem:[#allocation2 + $0x118] sm:$0xff]   ;;  %v2018_v47 = vld [vmem:[#allocation2 + $0x148] sm:$0xff]  }
 0x1b3   : > { %v545_v50 = vadd.f32 %v1815_v48, %v410_v45  ;;  %v2016_v45 = vld [vmem:[#allocation2 + $0x150] sm:$0xff]   ;;  %v2019_v48 = vld [vmem:[#allocation2 + $0x108] sm:$0xff]  }
 0x1b5   : > { %v548_v51 = vadd.f32 %v545_v50, %v542_v49 }
 0x1b7   : > { %v549_v52 = vrot.slane %v548_v51, 4 }
 0x1b9   : > { %v550_v53 = vadd.f32 %v549_v52, %v548_v51 }
 0x1bb   : > { %v551_v54 = vrot.slane %v550_v53, 2 }
 0x1bd   : > { %v552_v55 = vadd.f32 %v551_v54, %v550_v53 }
 0x1bf   : > { %v553_v56 = vrot.slane %v552_v55, 1 }
 0x1c1   : > { %v554_v57 = vadd.f32 %v553_v56, %v552_v55 }
 0x1c3   : > { %v556_v58 = vmul.f32 0.0625, %v554_v57 }
 0x1c5   : > { %v557_v60 = vmul.f32 %v556_v58, %v290_v42  ;;  %v2013_v42 = vld [vmem:[#allocation2 + $0x120] sm:$0xff]  }
 0x1c7   : > { %v561_v61 = vrot.slane %v557_v60, %v2185_v59 }
 0x1c9   : > { %v562_v62 = vsub.f32 %v542_v49, %v561_v61  ;;  %v563_v63 = vsub.f32 %v545_v50, %v561_v61  ;;  %v1721_v50 = vld [vmem:[%s2265_s3 + $0x8] sm:$0xff] }
 0x1ca   : > { %v711_v53 = vrot.slane %v1721_v50, %v2179_v41 }
 0x1cb   : > { %v564_v0 = vmul.f32 %v562_v62, %v562_v62  ;;  %v565_v1 = vmul.f32 %v563_v63, %v563_v63  ;;  %v579_v16 = vmul.f32 %v577_v14, %v563_v63  ;;  %v578_v18 = vmul.f32 %v577_v14, %v562_v62 }
 0x1cd   : > { %v566_v4 = vadd.f32 %v565_v1, %v564_v0 }
 0x1cf   : > { %v567_v5 = vrot.slane %v566_v4, 4 }
 0x1d1   : > { %v568_v6 = vadd.f32 %v567_v5, %v566_v4 }
 0x1d3   : > { %v569_v7 = vrot.slane %v568_v6, 2 }
 0x1d5   : > { %v570_v8 = vadd.f32 %v569_v7, %v568_v6 }
 0x1d7   : > { %v571_v9 = vrot.slane %v570_v8, 1 }
 0x1d9   : > { %v572_v10 = vadd.f32 %v571_v9, %v570_v8 }
 0x1db   : > { %v573_v11 = vmul.f32 0.0625, %v572_v10 }
 0x1dd   : > { %v580_v12 = vadd.f32 1e-05, %v573_v11 }
 0x1df   : > { %2046 = vrsqrt.f32 %v580_v12 }
 0x1ec   : > { %v2047_v19 = vpop.eup %2046 }
 0x1ed   : > { %v583_v20 = vmul.f32 %v2047_v19, %v579_v16  ;;  %v582_v21 = vmul.f32 %v2047_v19, %v578_v18 }
 0x1ef   : > { %v589_v22 = vadd.f32 %v587_v17, %v583_v20  ;;  %v588_v23 = vadd.f32 %v587_v17, %v582_v21 }
 0x1f1   : > { %vm591_vm1 = vcmp.gt.f32.partialorder %v589_v22, 0.0  ;;  %v593_v24 = vmul.f32 0.1, %v589_v22  ;;  %vm590_vm2 = vcmp.gt.f32.partialorder %v588_v23, 0.0  ;;  %v592_v25 = vmul.f32 0.1, %v588_v23 }
 0x1f3   : > { %v595_v26 = vsel %vm591_vm1, %v589_v22, %v593_v24  ;;  %v594_v27 = vsel %vm590_vm2, %v588_v23, %v592_v25  ;;  %v877_v23 = vrot.slane %v1721_v50, %v2188_v13  ;;  %v887_v25 = vrot.slane %v1721_v50, %v2191_v15 }
 0x1f4   : > { %1910 = vmatprep.subr.mxu1 %v595_v26  ;;  %v674_v28 = vpack.c.bf16 %v595_v26, %v594_v27 }
 0x1f5   : > { %1911 = vmatpush3.msra.mxu1 %v595_v26 }
 0x1f6   : > { %1912 = vmatprep.subr.mxu1 %v594_v27  ;;  %840 = vmatprep.mubr.bf16.mxu0 %v674_v28 }
 0x1f7   : > { %1913 = vmatpush3.msra.mxu1 %v594_v27 }
 0x1f8   : > { %1915 = vmatmul.mubr.msk.f32.vlgmr.msra.gmra.mxu1 %vm291_vm0, %v2173_v3 }
 0x1f9   : > { %1921 = vmatprep.mubr.msk.f32.mxu1 %vm291_vm0, %v2169_v2 }
 0x2b8   : > { %v1916_v31 = vpop.f32.mrf.mxu1 }
 0x2ba   : > { %v664_v32 = vpop.f32.mrf.mxu1 }
 0x2bb   : > { %v673_v33 = vpack.c.bf16 %v1916_v31, %v664_v32 }
 0x2bd   : > { %841 = vmatmul.mubr.bf16.vlgmr.msra.gmra.mxu0 %v673_v33 }
 0x2be   : > { %1847 = vmatpush3.bf16.msra.mxu0 %v2007_v35 }
 0x2bf   : > { %1848 = vmatprep.subr.bf16.mxu0 %v2008_v36 }
 0x2c2   : > { %1849 = vmatpush3.bf16.msra.mxu0 %v2009_v37  ;;  %v2020_v37 = vld [vmem:[#allocation2 + $0x140] sm:$0xff]  }
 0x2c3   : > { %1850 = vmatprep.subr.bf16.mxu0 %v2010_v38  ;;  %v2021_v38 = vld [vmem:[#allocation2 + $0x100] sm:$0xff]  }
 0x2c6   : > { %1851 = vmatpush3.bf16.msra.mxu0 %v2011_v39 }
 0x2c7   : > { %1852 = vmatprep.subr.bf16.mxu0 %v2012_v40 }
 0x2ca   : > { %1853 = vmatpush3.bf16.msra.mxu0 %v2013_v42 }
 0x2cb   : > { %1854 = vmatprep.subr.bf16.mxu0 %v2014_v43 }
 0x2ce   : > { %1855 = vmatpush3.bf16.msra.mxu0 %v2015_v44  ;;  %v1740_v44 = vld [vmem:[%s2265_s3 + $0x10] sm:$0xff] }
 0x2cf   : > { %1856 = vmatprep.subr.bf16.mxu0 %v2016_v45 }
 0x2d2   : > { %1857 = vmatpush3.bf16.msra.mxu0 %v2017_v46 }
 0x2d3   : > { %1858 = vmatprep.subr.bf16.mxu0 %v2018_v47  ;;  %v1011_v47 = vrot.slane %v1740_v44, %v2179_v41 }
 0x2d6   : > { %1859 = vmatpush3.bf16.msra.mxu0 %v2019_v48 }
 0x2d7   : > { %1860 = vmatprep.subr.bf16.mxu0 %v2020_v37  ;;  %v2029_v37 = vld [vmem:[#allocation2 + $0x1a0] sm:$0xff]  }
 0x2da   : > { %1861 = vmatpush3.bf16.msra.mxu0 %v2021_v38  ;;  %v2030_v38 = vld [vmem:[#allocation2 + $0x1d8] sm:$0xff]  }
 0x37d   : > { %v1836_v49 = vpop.f32.mrf.mxu0 }
 0x37f   : > { %v1837_v51 = vpop.f32.mrf.mxu0 }
 0x380   : > { %v1838_v54 = vadd.f32 %v1837_v51, %v1836_v49 }
 0x381   : > { %v1839_v52 = vpop.f32.mrf.mxu0 }
 0x382   : > { %v843_v57 = vadd.f32 %v1838_v54, %v711_v53 }
 0x383   : > { %v1840_v55 = vpop.f32.mrf.mxu0 }
 0x384   : > { %v1841_v56 = vadd.f32 %v1840_v55, %v1839_v52 }
 0x386   : > { %v846_v58 = vadd.f32 %v1841_v56, %v711_v53 }
 0x388   : > { %v849_v60 = vadd.f32 %v846_v58, %v843_v57 }
 0x38a   : > { %v850_v61 = vrot.slane %v849_v60, 4 }
 0x38c   : > { %v851_v62 = vadd.f32 %v850_v61, %v849_v60 }
 0x38e   : > { %v852_v63 = vrot.slane %v851_v62, 2 }
 0x390   : > { %v853_v0 = vadd.f32 %v852_v63, %v851_v62 }
 0x392   : > { %v854_v1 = vrot.slane %v853_v0, 1 }
 0x394   : > { %v855_v4 = vadd.f32 %v854_v1, %v853_v0 }
 0x396   : > { %v856_v5 = vmul.f32 0.0625, %v855_v4 }
 0x398   : > { %v857_v6 = vmul.f32 %v1721_v50, %v856_v5 }
 0x39a   : > { %v861_v7 = vrot.slane %v857_v6, %v2185_v59 }
 0x39c   : > { %v862_v8 = vsub.f32 %v843_v57, %v861_v7  ;;  %v863_v9 = vsub.f32 %v846_v58, %v861_v7 }
 0x39e   : > { %v864_v10 = vmul.f32 %v862_v8, %v862_v8  ;;  %v865_v11 = vmul.f32 %v863_v9, %v863_v9  ;;  %v879_v24 = vmul.f32 %v877_v23, %v863_v9  ;;  %v878_v26 = vmul.f32 %v877_v23, %v862_v8 }
 0x3a0   : > { %v866_v12 = vadd.f32 %v865_v11, %v864_v10 }
 0x3a2   : > { %v867_v14 = vrot.slane %v866_v12, 4 }
 0x3a4   : > { %v868_v16 = vadd.f32 %v867_v14, %v866_v12 }
 0x3a6   : > { %v869_v17 = vrot.slane %v868_v16, 2 }
 0x3a8   : > { %v870_v18 = vadd.f32 %v869_v17, %v868_v16  ;;  %v1177_v16 = vrot.slane %v1740_v44, %v2188_v13 }
 0x3aa   : > { %v871_v19 = vrot.slane %v870_v18, 1 }
 0x3ac   : > { %v872_v20 = vadd.f32 %v871_v19, %v870_v18  ;;  %v1187_v18 = vrot.slane %v1740_v44, %v2191_v15 }
 0x3ae   : > { %v873_v21 = vmul.f32 0.0625, %v872_v20 }
 0x3b0   : > { %v880_v22 = vadd.f32 1e-05, %v873_v21 }
 0x3b2   : > { %2048 = vrsqrt.f32 %v880_v22 }
 0x3bf   : > { %v2049_v27 = vpop.eup %2048 }
 0x3c0   : > { %v883_v28 = vmul.f32 %v2049_v27, %v879_v24  ;;  %v882_v29 = vmul.f32 %v2049_v27, %v878_v26 }
 0x3c2   : > { %v889_v30 = vadd.f32 %v887_v25, %v883_v28  ;;  %v888_v31 = vadd.f32 %v887_v25, %v882_v29  ;;  %v2022_v29 = vld [vmem:[#allocation2 + $0x1f8] sm:$0xff]  }
 0x3c4   : > { %vm891_vm3 = vcmp.gt.f32.partialorder %v889_v30, 0.0  ;;  %v893_v32 = vmul.f32 0.1, %v889_v30  ;;  %vm890_vm4 = vcmp.gt.f32.partialorder %v888_v31, 0.0  ;;  %v892_v33 = vmul.f32 0.1, %v888_v31 }
 0x3c6   : > { %v895_v34 = vsel %vm891_vm3, %v889_v30, %v893_v32  ;;  %v894_v35 = vsel %vm890_vm4, %v888_v31, %v892_v33  ;;  %v2023_v30 = vld [vmem:[#allocation2 + $0x1b8] sm:$0xff]   ;;  %v2024_v31 = vld [vmem:[#allocation2 + $0x1f0] sm:$0xff]  }
 0x3c7   : > { %1917 = vmatprep.subr.mxu1 %v895_v34  ;;  %v974_v36 = vpack.c.bf16 %v895_v34, %v894_v35  ;;  %v2025_v33 = vld [vmem:[#allocation2 + $0x1b0] sm:$0xff]  }
 0x3c8   : > { %1918 = vmatpush3.msra.mxu1 %v895_v34  ;;  %v2026_v34 = vld [vmem:[#allocation2 + $0x1e8] sm:$0xff]  }
 0x3c9   : > { %1919 = vmatprep.subr.mxu1 %v894_v35  ;;  %1140 = vmatprep.mubr.bf16.mxu0 %v974_v36  ;;  %v2028_v36 = vld [vmem:[#allocation2 + $0x1e0] sm:$0xff]  }
 0x3ca   : > { %1920 = vmatpush3.msra.mxu1 %v894_v35  ;;  %v2027_v35 = vld [vmem:[#allocation2 + $0x1a8] sm:$0xff]  }
 0x3cb   : > { %1922 = vmatmul.mubr.msk.f32.vlgmr.msra.gmra.mxu1 %vm291_vm0, %v2173_v3 }
 0x3cc   : > { %1928 = vmatprep.mubr.msk.f32.mxu1 %vm291_vm0, %v2169_v2 }
 0x48b   : > { %v1923_v39 = vpop.f32.mrf.mxu1 }
 0x48d   : > { %v964_v40 = vpop.f32.mrf.mxu1 }
 0x48e   : > { %v973_v42 = vpack.c.bf16 %v1923_v39, %v964_v40  ;;  %v2031_v39 = vld [vmem:[#allocation2 + $0x198] sm:$0xff]   ;;  %v2032_v40 = vld [vmem:[#allocation2 + $0x1d0] sm:$0xff]  }
 0x490   : > { %1141 = vmatmul.mubr.bf16.vlgmr.msra.gmra.mxu0 %v973_v42  ;;  %v2034_v42 = vld [vmem:[#allocation2 + $0x1c8] sm:$0xff]  }
 0x550   : > { %v1862_v43 = vpop.f32.mrf.mxu0 }
 0x552   : > { %v1863_v45 = vpop.f32.mrf.mxu0 }
 0x553   : > { %v1864_v48 = vadd.f32 %v1863_v45, %v1862_v43  ;;  %v2035_v43 = vld [vmem:[#allocation2 + $0x188] sm:$0xff]   ;;  %v2037_v45 = vld [vmem:[#allocation2 + $0x180] sm:$0xff]  }
 0x554   : > { %v1865_v46 = vpop.f32.mrf.mxu0 }
 0x555   : > { %v1143_v50 = vadd.f32 %v1864_v48, %v1011_v47 }
 0x556   : > { %v1866_v49 = vpop.f32.mrf.mxu0 }
 0x557   : > { %v1867_v2 = vadd.f32 %v1866_v49, %v1865_v46  ;;  %v2038_v49 = vld [vmem:[%s2266_s4 + $0x38] sm:$0xff]  }
 0x559   : > { %v1146_v51 = vadd.f32 %v1867_v2, %v1011_v47  ;;  %v2097_v2 = vmov 0.0  }
 0x55a   : > { %1931 = vmatprep.subr.bf16.mxu0 %v2097_v2  ;;  %1947 = vmatprep.mubr.msk.bf16.mxu0 %vm2098_vm7, %v2097_v2 }
 0x55b   : > { %v1149_v52 = vadd.f32 %v1146_v51, %v1143_v50  ;;  %1932 = vmatpush3.bf16.msra.mxu0 %v2038_v49 }
 0x55c   : > { %1933 = vmatprep.subr.bf16.mxu0 %v2097_v2 }
 0x55d   : > { %v1150_v53 = vrot.slane %v1149_v52, 4 }
 0x55f   : > { %v1151_v54 = vadd.f32 %v1150_v53, %v1149_v52  ;;  %v2041_v52 = vld [vmem:[%s2266_s4 + $0x20] sm:$0xff]   ;;  %v2042_v53 = vld [vmem:[%s2266_s4 + $0x18] sm:$0xff]  }
 0x561   : > { %v1152_v55 = vrot.slane %v1151_v54, 2 }
 0x563   : > { %v1153_v56 = vadd.f32 %v1152_v55, %v1151_v54  ;;  %v2043_v54 = vld [vmem:[%s2266_s4 + $0x10] sm:$0xff]   ;;  %v2044_v55 = vld [vmem:[%s2266_s4 + $0x8] sm:$0xff]  }
 0x565   : > { %v1154_v57 = vrot.slane %v1153_v56, 1 }
 0x567   : > { %v1155_v58 = vadd.f32 %v1154_v57, %v1153_v56  ;;  %v2045_v56 = vld [vmem:[%s2266_s4] sm:$0xff]  }
 0x569   : > { %v1156_v60 = vmul.f32 0.0625, %v1155_v58  ;;  %v1759_v58 = vld [vmem:[%s2265_s3 + $0x18] sm:$0xff] }
 0x56b   : > { %v1157_v61 = vmul.f32 %v1740_v44, %v1156_v60  ;;  %v2036_v44 = vld [vmem:[#allocation2 + $0x1c0] sm:$0xff]  }
 0x56d   : > { %v1161_v62 = vrot.slane %v1157_v61, %v2185_v59 }
 0x56f   : > { %v1162_v63 = vsub.f32 %v1143_v50, %v1161_v62  ;;  %v1163_v0 = vsub.f32 %v1146_v51, %v1161_v62  ;;  %v2039_v50 = vld [vmem:[%s2266_s4 + $0x30] sm:$0xff]   ;;  %v2040_v51 = vld [vmem:[%s2266_s4 + $0x28] sm:$0xff]   ;;  %v1311_v62 = vrot.slane %v1759_v58, %v2179_v41 }
 0x570   : > { %1934 = vmatpush3.bf16.msra.mxu0 %v2039_v50 }
 0x571   : > { %v1164_v1 = vmul.f32 %v1162_v63, %v1162_v63  ;;  %v1165_v4 = vmul.f32 %v1163_v0, %v1163_v0  ;;  %v1179_v17 = vmul.f32 %v1177_v16, %v1163_v0  ;;  %v1178_v19 = vmul.f32 %v1177_v16, %v1162_v63  ;;  %1935 = vmatprep.subr.bf16.mxu0 %v2097_v2 }
 0x573   : > { %v1166_v5 = vadd.f32 %v1165_v4, %v1164_v1 }
 0x574   : > { %1936 = vmatpush3.bf16.msra.mxu0 %v2040_v51  ;;  %v1519_v51 = vld [vmem:[%s2267_s5] sm:$0x1] }
 0x575   : > { %v1167_v6 = vrot.slane %v1166_v5, 4  ;;  %1937 = vmatprep.subr.bf16.mxu0 %v2097_v2 }
 0x577   : > { %v1168_v7 = vadd.f32 %v1167_v6, %v1166_v5 }
 0x578   : > { %1938 = vmatpush3.bf16.msra.mxu0 %v2041_v52 }
 0x579   : > { %v1169_v8 = vrot.slane %v1168_v7, 2  ;;  %1939 = vmatprep.subr.bf16.mxu0 %v2097_v2 }
 0x57b   : > { %v1170_v9 = vadd.f32 %v1169_v8, %v1168_v7 }
 0x57c   : > { %1940 = vmatpush3.bf16.msra.mxu0 %v2042_v53 }
 0x57d   : > { %v1171_v10 = vrot.slane %v1170_v9, 1  ;;  %1941 = vmatprep.subr.bf16.mxu0 %v2097_v2 }
 0x57f   : > { %v1172_v11 = vadd.f32 %v1171_v10, %v1170_v9 }
 0x580   : > { %1942 = vmatpush3.bf16.msra.mxu0 %v2043_v54 }
 0x581   : > { %v1173_v12 = vmul.f32 0.0625, %v1172_v11  ;;  %1943 = vmatprep.subr.bf16.mxu0 %v2097_v2 }
 0x583   : > { %v1180_v14 = vadd.f32 1e-05, %v1173_v12 }
 0x584   : > { %1944 = vmatpush3.bf16.msra.mxu0 %v2044_v55 }
 0x585   : > { %2050 = vrsqrt.f32 %v1180_v14  ;;  %1945 = vmatprep.subr.bf16.mxu0 %v2097_v2 }
 0x588   : > { %1946 = vmatpush3.bf16.msra.mxu0 %v2045_v56 }
 0x592   : > { %v2051_v20 = vpop.eup %2050 }
 0x593   : > { %v1183_v21 = vmul.f32 %v2051_v20, %v1179_v17  ;;  %v1182_v22 = vmul.f32 %v2051_v20, %v1178_v19 }
 0x595   : > { %v1189_v23 = vadd.f32 %v1187_v18, %v1183_v21  ;;  %v1188_v24 = vadd.f32 %v1187_v18, %v1182_v22 }
 0x597   : > { %vm1191_vm5 = vcmp.gt.f32.partialorder %v1189_v23, 0.0  ;;  %v1193_v25 = vmul.f32 0.1, %v1189_v23  ;;  %vm1190_vm6 = vcmp.gt.f32.partialorder %v1188_v24, 0.0  ;;  %v1192_v26 = vmul.f32 0.1, %v1188_v24 }
 0x599   : > { %v1195_v27 = vsel %vm1191_vm5, %v1189_v23, %v1193_v25  ;;  %v1194_v28 = vsel %vm1190_vm6, %v1188_v24, %v1192_v26 }
 0x59a   : > { %1924 = vmatprep.subr.mxu1 %v1195_v27  ;;  %v1274_v32 = vpack.c.bf16 %v1195_v27, %v1194_v28 }
 0x59b   : > { %1925 = vmatpush3.msra.mxu1 %v1195_v27 }
 0x59c   : > { %1926 = vmatprep.subr.mxu1 %v1194_v28 }
 0x59d   : > { %1927 = vmatpush3.msra.mxu1 %v1194_v28 }
 0x59e   : > { %1929 = vmatmul.mubr.msk.f32.vlgmr.msra.gmra.mxu1 %vm291_vm0, %v2173_v3  ;;  %1872 = vmatprep.subr.bf16.mxu1 %v2022_v29  ;;  %v2033_v3 = vld [vmem:[#allocation2 + $0x190] sm:$0xff]  }
 0x59f   : > { %1440 = vmatprep.mubr.bf16.mxu1 %v1274_v32  ;;  %1873 = vmatpush3.bf16.msra.mxu1 %v2023_v30 }
 0x5a0   : > { %1874 = vmatprep.subr.bf16.mxu1 %v2024_v31  ;;  %v1477_v31 = vrot.slane %v1759_v58, %v2188_v13 }
 0x5a3   : > { %1875 = vmatpush3.bf16.msra.mxu1 %v2025_v33  ;;  %v1487_v33 = vrot.slane %v1759_v58, %v2191_v15 }
 0x5a4   : > { %1876 = vmatprep.subr.bf16.mxu1 %v2026_v34 }
 0x5a7   : > { %1877 = vmatpush3.bf16.msra.mxu1 %v2027_v35 }
 0x5a8   : > { %1878 = vmatprep.subr.bf16.mxu1 %v2028_v36 }
 0x5ab   : > { %1879 = vmatpush3.bf16.msra.mxu1 %v2029_v37 }
 0x5ac   : > { %1880 = vmatprep.subr.bf16.mxu1 %v2030_v38 }
 0x5af   : > { %1881 = vmatpush3.bf16.msra.mxu1 %v2031_v39  ;;  %v2054_v39 = vld [vmem:[%s2162_s10] sm:$0xff] }
 0x5b0   : > { %1882 = vmatprep.subr.bf16.mxu1 %v2032_v40 }
 0x5b3   : > { %1883 = vmatpush3.bf16.msra.mxu1 %v2033_v3  ;;  %v2055_v3 = vld [vmem:[%s2162_s10 + $0x8] sm:$0xff]  ;;  %s1702_s10 = sshll.u32 %s2271_s22, 3 }
 0x5b4   : > { %1884 = vmatprep.subr.bf16.mxu1 %v2034_v42  ;;  %s284_s23 = scalar_lea.vmem %s2268_s6, %s1702_s10 }
 0x5b7   : > { %1885 = vmatpush3.bf16.msra.mxu1 %v2035_v43 }
 0x5b8   : > { %1886 = vmatprep.subr.bf16.mxu1 %v2036_v44 }
 0x5bb   : > { %1887 = vmatpush3.bf16.msra.mxu1 %v2037_v45 }
 0x65e   : > { %v1930_v46 = vpop.f32.mrf.mxu1 }
 0x660   : > { %v1264_v47 = vpop.f32.mrf.mxu1 }
 0x661   : > { %v1273_v48 = vpack.c.bf16 %v1930_v46, %v1264_v47 }
 0x663   : > { %1441 = vmatmul.mubr.bf16.vlgmr.msra.gmra.mxu1 %v1273_v48 }
 0x723   : > { %v1888_v57 = vpop.f32.mrf.mxu1 }
 0x725   : > { %v1889_v60 = vpop.f32.mrf.mxu1 }
 0x726   : > { %v1890_v63 = vadd.f32 %v1889_v60, %v1888_v57 }
 0x727   : > { %v1891_v61 = vpop.f32.mrf.mxu1 }
 0x728   : > { %v1443_v4 = vadd.f32 %v1890_v63, %v1311_v62 }
 0x729   : > { %v1892_v0 = vpop.f32.mrf.mxu1 }
 0x72a   : > { %v1893_v1 = vadd.f32 %v1892_v0, %v1891_v61 }
 0x72c   : > { %v1446_v5 = vadd.f32 %v1893_v1, %v1311_v62 }
 0x72e   : > { %v1449_v6 = vadd.f32 %v1446_v5, %v1443_v4 }
 0x730   : > { %v1450_v7 = vrot.slane %v1449_v6, 4 }
 0x732   : > { %v1451_v8 = vadd.f32 %v1450_v7, %v1449_v6 }
 0x734   : > { %v1452_v9 = vrot.slane %v1451_v8, 2 }
 0x736   : > { %v1453_v10 = vadd.f32 %v1452_v9, %v1451_v8 }
 0x738   : > { %v1454_v11 = vrot.slane %v1453_v10, 1 }
 0x73a   : > { %v1455_v12 = vadd.f32 %v1454_v11, %v1453_v10 }
 0x73c   : > { %v1456_v14 = vmul.f32 0.0625, %v1455_v12 }
 0x73e   : > { %v1457_v16 = vmul.f32 %v1759_v58, %v1456_v14 }
 0x740   : > { %v1461_v17 = vrot.slane %v1457_v16, %v2185_v59 }
 0x742   : > { %v1462_v18 = vsub.f32 %v1443_v4, %v1461_v17  ;;  %v1463_v19 = vsub.f32 %v1446_v5, %v1461_v17 }
 0x744   : > { %v1464_v20 = vmul.f32 %v1462_v18, %v1462_v18  ;;  %v1465_v21 = vmul.f32 %v1463_v19, %v1463_v19  ;;  %v1478_v32 = vmul.f32 %v1477_v31, %v1462_v18  ;;  %v1479_v59 = vmul.f32 %v1477_v31, %v1463_v19 }
 0x746   : > { %v1466_v22 = vadd.f32 %v1465_v21, %v1464_v20 }
 0x748   : > { %v1467_v23 = vrot.slane %v1466_v22, 4 }
 0x74a   : > { %v1468_v24 = vadd.f32 %v1467_v23, %v1466_v22 }
 0x74c   : > { %v1469_v25 = vrot.slane %v1468_v24, 2 }
 0x74e   : > { %v1470_v26 = vadd.f32 %v1469_v25, %v1468_v24 }
 0x750   : > { %v1471_v27 = vrot.slane %v1470_v26, 1 }
 0x752   : > { %v1472_v28 = vadd.f32 %v1471_v27, %v1470_v26 }
 0x754   : > { %v1473_v29 = vmul.f32 0.0625, %v1472_v28 }
 0x756   : > { %v1480_v30 = vadd.f32 1e-05, %v1473_v29 }
 0x758   : > { %2052 = vrsqrt.f32 %v1480_v30 }
 0x765   : > { %v2053_v34 = vpop.eup %2052 }
 0x766   : > { %v1482_v35 = vmul.f32 %v2053_v34, %v1478_v32  ;;  %v1483_v36 = vmul.f32 %v2053_v34, %v1479_v59 }
 0x768   : > { %v1488_v37 = vadd.f32 %v1487_v33, %v1482_v35  ;;  %v1489_v38 = vadd.f32 %v1487_v33, %v1483_v36 }
 0x76a   : > { %v1490_v40 = vadd.f32 %v2054_v39, %v1488_v37  ;;  %v1491_v42 = vadd.f32 %v2055_v3, %v1489_v38 }
 0x76c   : > { %v1493_v43 = vmax.f32 %v1491_v42, 0.0  ;;  %v1492_v44 = vmax.f32 %v1490_v40, 0.0 }
 0x76e   : > { %v1494_v45 = vadd.f32 %v1493_v43, %v1492_v44 }
 0x770   : > { %v1495_v46 = vrot.slane %v1494_v45, 4 }
 0x772   : > { %v1496_v47 = vadd.f32 %v1495_v46, %v1494_v45 }
 0x774   : > { %v1497_v13 = vrot.slane %v1496_v47, 2 }
 0x776   : > { %v1498_v48 = vadd.f32 %v1497_v13, %v1496_v47 }
 0x778   : > { %v1499_v49 = vrot.slane %v1498_v48, 1 }
 0x77a   : > { %v1500_v2 = vadd.f32 %v1499_v49, %v1498_v48 }
 0x77c   : > { %v1501_v15 = vmul.f32 0.0625, %v1500_v2 }
 0x77e   : > { %v1502_v50 = vpack.c.bf16 %v1501_v15, %v1501_v15 }
 0x780   : > { %1948 = vmatmul.mubr.bf16.vlgmr.msra.gmra.mxu0 %v1502_v50 }
 0x840   : > { %v1602_v52 = vpop.f32.mrf.mxu0 }
 0x841   : > { %v1603_v53 = vadd.f32 %v1602_v52, %v1519_v51 }
 0x842   : > { %v1949_v54 = vpop.f32.mrf.mxu0 }
 0x843   : > { %v1608_v55 = vmax.f32 %v1603_v53, 0.0 }
 0x844   : > { %v1605_v56 = vpop.f32.mrf.mxu0 }
 0x845   : > { %v1612_v57 = vrot.slane %v1608_v55, %v2179_v41 }
 0x846   : > { %v1950_v58 = vpop.f32.mrf.mxu0 }
 0x847   : > { %1613 = vst [vmem:[%s284_s23] sm:$0xff] %v1612_v57 }
 0x848 PF: > { %s17_s21 = sadd.s32 1, %s2092_s21  }
 0x849   : > { %p14_p1 = scmp.ge.s32.totalorder %s17_s21, 6  }
 0x84b   :  { %16 = sbr.rel (!%p14_p1) target bundleno = 1 (0x1), region = 88 }
 0x850   :  { %1633 = vsyncpa [#allocation3], 1 }
 0x851   :  { %1635 = vsyncpa [#allocation3 + $0x1], 1 }

</bundles_post_ra>
